<compile_context>
chip_gen: v7x
topology: tpu7x:2x2x1
jax: 0.10.0
libtpu: 0.0.40
codegen_flags: <defaults>
</compile_context>

<pallas_src>
import functools

import jax
import jax.numpy as jnp
import numpy as np
from jax.experimental import pallas as pl
from jax.experimental.pallas import tpu as pltpu

_LANE = 128


def _ce_partial_kernel(x_ref, t_ref, out_ref, *, hw, tile):
    # x_ref  : (1, C, TILE) logits in input dtype (classes on sublanes, pixels on lanes)
    # t_ref  : (1, 1, TILE) int32 targets
    # out_ref: (1, 1, 1)    f32 per-batch partial CE sum (resident across the j axis)
    j = pl.program_id(1)

    @pl.when(j == 0)
    def _():
        out_ref[...] = jnp.zeros_like(out_ref)

    x = x_ref[0].astype(jnp.float32)        # (C, TILE)
    t = t_ref[0]                            # (1, TILE)

    # Per-pixel log-sum-exp over the class (sublane) axis, numerically stable.
    m = jnp.max(x, axis=0, keepdims=True)                                    # (1, TILE)
    lse = m + jnp.log(jnp.sum(jnp.exp(x - m), axis=0, keepdims=True))        # (1, TILE)

    # Gather the target logit with compare+select on the VPU (C is tiny; no MXU).
    # TODO(synk): targets outside [0, C) (e.g. an ignore_index) are not handled,
    # matching the original kernel -- they silently contribute ce = lse.
    cls = jax.lax.broadcasted_iota(jnp.int32, x.shape, 0)                    # (C, TILE)
    tgt_logit = jnp.sum(jnp.where(cls == t, x, 0.0), axis=0, keepdims=True)  # (1, TILE)

    ce = lse - tgt_logit                                                     # (1, TILE)

    # Mask lane padding (pixels >= H*W contribute nothing to the mean).
    pix = j * tile + jax.lax.broadcasted_iota(jnp.int32, ce.shape, 1)
    ce = jnp.where(pix < hw, ce, 0.0)

    out_ref[...] += jnp.sum(ce)


def focal_loss(inputs, targets, *, gamma=0.0, eps=1e-07):
    """inputs: (N, C, H, W) float logits; targets: (N, H, W) int class ids."""
    del eps  # unused in the PyTorch forward as well
    N, C, H, W = inputs.shape
    HW = H * W
    M = N * HW

    # Native NCHW layout: (N, C, HW) is a free reshape -- no transpose pass.
    x = inputs.reshape(N, C, HW)                       # keep original dtype in HBM
    t = targets.reshape(N, 1, HW).astype(jnp.int32)

    # Lane padding only if HW is not a multiple of 128 (no-op for typical shapes).
    hw_pad = ((HW + _LANE - 1) // _LANE) * _LANE
    if hw_pad != HW:
        x = jnp.pad(x, ((0, 0), (0, 0), (0, hw_pad - HW)))
        t = jnp.pad(t, ((0, 0), (0, 0), (0, hw_pad - HW)))

    # Pixel tile: as many lanes as available up to 2048 (amortizes ~0.35us/step),
    # capped so the double-buffered logits block stays well inside scoped VMEM,
    # and chosen to divide hw_pad so no out-of-bounds blocks exist.
    itemsize = jnp.dtype(inputs.dtype).itemsize
    vmem_cap_tile = max(_LANE, ((4 << 20) // max(1, C * itemsize)) // _LANE * _LANE)
    tile = min(2048, hw_pad, vmem_cap_tile)
    while hw_pad % tile != 0:
        tile -= _LANE
    grid_j = hw_pad // tile

    kernel = functools.partial(_ce_partial_kernel, hw=HW, tile=tile)

    cost = pl.CostEstimate(
        flops=int(M * (6 * C + 8)),
        transcendentals=int(M * (C + 1)),
        bytes_accessed=int(x.size * itemsize + t.size * 4 + N * 4),
    )

    partial_ce = pl.pallas_call(
        kernel,
        out_shape=jax.ShapeDtypeStruct((N, 1, 1), jnp.float32),
        grid=(N, grid_j),
        in_specs=[
            pl.BlockSpec((1, C, tile), lambda n, j: (n, 0, j)),
            pl.BlockSpec((1, 1, tile), lambda n, j: (n, 0, j)),
        ],
        out_specs=pl.BlockSpec((1, 1, 1), lambda n, j: (n, 0, 0)),
        compiler_params=pltpu.CompilerParams(
            dimension_semantics=("parallel", "arbitrary"),
        ),
        cost_estimate=cost,
    )(x, t)

    # Tiny scalar epilogue: sum the per-batch partials, apply the focal transform.
    log_p = jnp.sum(partial_ce) / jnp.float32(M)       # == mean cross-entropy
    p = jnp.exp(-log_p)
    return (1.0 - p) ** jnp.float32(gamma) * log_p


def _reference_focal_loss(inputs, targets, gamma):
    # Pure-JAX reference mirroring torch.nn.CrossEntropyLoss(reduction='mean').
    N, C, H, W = inputs.shape
    logits = jnp.transpose(inputs, (0, 2, 3, 1)).reshape(-1, C).astype(jnp.float32)
    tgt = targets.reshape(-1).astype(jnp.int32)
    logp = jax.nn.log_softmax(logits, axis=-1)
    ce = -jnp.take_along_axis(logp, tgt[:, None], axis=-1)[:, 0]
    log_p = jnp.mean(ce)
    p = jnp.exp(-log_p)
    return (1.0 - p) ** gamma * log_p


if __name__ == "__main__":
    key = jax.random.PRNGKey(0)
    k1, k2 = jax.random.split(key)

    N, C, H, W = 2, 4, 16, 16
    gamma = 2.0  # module default is 0; nonzero exercises the focal term

    inputs = jax.random.normal(k1, (N, C, H, W), dtype=jnp.float32)
    targets = jax.random.randint(k2, (N, H, W), 0, C, dtype=jnp.int32)

    loss = focal_loss(inputs, targets, gamma=gamma)
    loss = jax.block_until_ready(loss)

    ref = _reference_focal_loss(inputs, targets, gamma)
    np.testing.assert_allclose(np.asarray(loss), np.asarray(ref), rtol=1e-5, atol=1e-6)

    print("KERNEL_OK")
</pallas_src>

<mosaic_0001>
module attributes {stable_mosaic.version = 11 : i64} {
  func.func @_ce_partial_kernel(%arg0: i32, %arg1: i32, %arg2: memref<1x4x256xf32, #tpu.memory_space<vmem>>, %arg3: memref<1x1x256xi32, #tpu.memory_space<vmem>>, %arg4: memref<1x1x1xf32, #tpu.memory_space<vmem>>) attributes {dimension_semantics = [#tpu.dimension_semantics<parallel>, #tpu.dimension_semantics<arbitrary>], iteration_bounds = array<i64: 2, 1>, scalar_prefetch = 0 : i64, scratch_operands = 0 : i64, tpu.core_type = #tpu.core_type<tc>, window_params = [{transform_indices = @transform_0, window_bounds = array<i64: 1, 4, 256>}, {transform_indices = @transform_1, window_bounds = array<i64: 1, 1, 256>}, {transform_indices = @transform_2, window_bounds = array<i64: 1, 1, 1>}]} {
    %c0_i32 = arith.constant 0 : i32
    %0 = arith.cmpi eq, %arg1, %c0_i32 : i32
    %1 = arith.extui %0 : i1 to i32
    %c0_i32_0 = arith.constant 0 : i32
    %2 = arith.cmpi ne, %1, %c0_i32_0 : i32
    scf.if %2 {
      %cst_18 = arith.constant 0.000000e+00 : f32
      %40 = vector.broadcast %cst_18 : f32 to vector<1x1x1xf32>
      %c0_19 = arith.constant 0 : index
      %c0_20 = arith.constant 0 : index
      %c0_21 = arith.constant 0 : index
      %41 = vector.load %arg4[%c0_19, %c0_20, %c0_21] : memref<1x1x1xf32, #tpu.memory_space<vmem>>, vector<1x1x1xf32>
      tpu.vector_store %arg4[%c0_19, %c0_20, %c0_21], %40 {strides = array<i32>} : memref<1x1x1xf32, #tpu.memory_space<vmem>>, vector<1x1x1xf32>,
    } else {
    }
    %c0 = arith.constant 0 : index
    %c0_1 = arith.constant 0 : index
    %c0_2 = arith.constant 0 : index
    %3 = vector.load %arg2[%c0, %c0_1, %c0_2] : memref<1x4x256xf32, #tpu.memory_space<vmem>>, vector<1x4x256xf32>
    %4 = vector.shape_cast %3 : vector<1x4x256xf32> to vector<4x256xf32>
    %c0_3 = arith.constant 0 : index
    %c0_4 = arith.constant 0 : index
    %c0_5 = arith.constant 0 : index
    %5 = vector.load %arg3[%c0_3, %c0_4, %c0_5] : memref<1x1x256xi32, #tpu.memory_space<vmem>>, vector<1x1x256xi32>
    %6 = vector.shape_cast %5 : vector<1x1x256xi32> to vector<1x256xi32>
    %cst = arith.constant dense<0xFF800000> : vector<256xf32>
    %7 = vector.multi_reduction <maximumf>, %4, %cst [0] : vector<4x256xf32> to vector<256xf32>
    %8 = vector.shape_cast %7 : vector<256xf32> to vector<1x256xf32>
    %9 = vector.broadcast %8 : vector<1x256xf32> to vector<4x256xf32>
    %10 = arith.subf %4, %9 : vector<4x256xf32>
    %11 = math.exp %10 : vector<4x256xf32>
    %cst_6 = arith.constant dense<0.000000e+00> : vector<256xf32>
    %12 = vector.multi_reduction <add>, %11, %cst_6 [0] : vector<4x256xf32> to vector<256xf32>
    %13 = vector.shape_cast %12 : vector<256xf32> to vector<1x256xf32>
    %14 = math.log %13 : vector<1x256xf32>
    %15 = arith.addf %8, %14 : vector<1x256xf32>
    %16 = tpu.iota {dimensions = array<i32: 0>} : vector<4x256xi32>
    %17 = vector.broadcast %6 : vector<1x256xi32> to vector<4x256xi32>
    %18 = arith.cmpi eq, %16, %17 : vector<4x256xi32>
    %cst_7 = arith.constant 0.000000e+00 : f32
    %19 = vector.broadcast %cst_7 : f32 to vector<4x256xf32>
    %20 = arith.select %18, %4, %19 : vector<4x256xi1>, vector<4x256xf32>
    %cst_8 = arith.constant dense<0.000000e+00> : vector<256xf32>
    %21 = vector.multi_reduction <add>, %20, %cst_8 [0] : vector<4x256xf32> to vector<256xf32>
    %22 = vector.shape_cast %21 : vector<256xf32> to vector<1x256xf32>
    %23 = arith.subf %15, %22 : vector<1x256xf32>
    %c256_i32 = arith.constant 256 : i32
    %24 = arith.muli %arg1, %c256_i32 : i32
    %25 = tpu.iota {dimensions = array<i32: 1>} : vector<1x256xi32>
    %26 = vector.broadcast %24 : i32 to vector<1x256xi32>
    %27 = arith.addi %26, %25 : vector<1x256xi32>
    %c256_i32_9 = arith.constant 256 : i32
    %28 = vector.broadcast %c256_i32_9 : i32 to vector<1x256xi32>
    %29 = arith.cmpi slt, %27, %28 : vector<1x256xi32>
    %cst_10 = arith.constant 0.000000e+00 : f32
    %30 = vector.broadcast %cst_10 : f32 to vector<1x256xf32>
    %31 = arith.select %29, %23, %30 : vector<1x256xi1>, vector<1x256xf32>
    %c0_11 = arith.constant 0 : index
    %c0_12 = arith.constant 0 : index
    %c0_13 = arith.constant 0 : index
    %32 = vector.load %arg4[%c0_11, %c0_12, %c0_13] : memref<1x1x1xf32, #tpu.memory_space<vmem>>, vector<1x1x1xf32>
    %33 = vector.shape_cast %31 : vector<1x256xf32> to vector<1x1x256xf32>
    %cst_14 = arith.constant dense<0.000000e+00> : vector<1xf32>
    %34 = vector.multi_reduction <add>, %33, %cst_14 [1, 2] : vector<1x1x256xf32> to vector<1xf32>
    %35 = vector.shape_cast %34 : vector<1xf32> to vector<1x1x1xf32>
    %36 = vector.extract %35[0, 0, 0] : f32 from vector<1x1x1xf32>
    %37 = vector.broadcast %36 : f32 to vector<1x1x1xf32>
    %38 = arith.addf %32, %37 : vector<1x1x1xf32>
    %c0_15 = arith.constant 0 : index
    %c0_16 = arith.constant 0 : index
    %c0_17 = arith.constant 0 : index
    %39 = vector.load %arg4[%c0_15, %c0_16, %c0_17] : memref<1x1x1xf32, #tpu.memory_space<vmem>>, vector<1x1x1xf32>
    tpu.vector_store %arg4[%c0_15, %c0_16, %c0_17], %38 {strides = array<i32>} : memref<1x1x1xf32, #tpu.memory_space<vmem>>, vector<1x1x1xf32>,
    return
  }
  func.func @transform_0(%arg0: i32, %arg1: i32) -> (i32, i32, i32) {
    %c0_i32 = arith.constant 0 : i32
    %c0_i32_0 = arith.constant 0 : i32
    return %arg0, %c0_i32, %arg1 : i32, i32, i32
  }
  func.func @transform_1(%arg0: i32, %arg1: i32) -> (i32, i32, i32) {
    %c0_i32 = arith.constant 0 : i32
    %c0_i32_0 = arith.constant 0 : i32
    return %arg0, %c0_i32, %arg1 : i32, i32, i32
  }
  func.func @transform_2(%arg0: i32, %arg1: i32) -> (i32, i32, i32) {
    %c0_i32 = arith.constant 0 : i32
    %c0_i32_0 = arith.constant 0 : i32
    %c0_i32_1 = arith.constant 0 : i32
    return %arg0, %c0_i32, %c0_i32_0 : i32, i32, i32
  }
}

</mosaic_0001>

<bundles_post_ra>
// kernel: tpu_custom_call.1
= control target key start
LH: loop header
LB: loop body
LE: loop exit
PB: predicated region body
PF: predicated region fallthrough
CT: control target
= control target key end

     0   :  { %7 = vsyncpa [#allocation3], 0  ;;  %s824_s0 = inlined_call_operand.hbm [shape: f32[2,4,256], index: 0, kind: input, shape index: {}]   ;;  %s825_s1 = inlined_call_operand.hbm [shape: s32[2,1,256], index: 1, kind: input, shape index: {}]   ;;  %s826_s2 = inlined_call_operand.vmem [shape: f32[2,1,1], index: 2, kind: output, shape index: {}]  }
   0x1   :  { %9 = vsyncpa [#allocation3 + $0x1], 0 }
   0x2   :  { %10 = vsyncpa [#allocation5], 0 }
   0x3   :  { %12 = vsyncpa [#allocation5 + $0x1], 0  ;;  %s650_s9 = smov 0   ;;  %s652_s10 = smov 0  }
   0x4   :  { %s654_s11 = smov 0   ;;  %s656_s12 = smov 0  }
   0x5   :  { %s658_s13 = smov 0   ;;  %s660_s14 = smov 0  }
   0x6 LB: > { %s429_s15 = sadd.s32 4294967295, %s630_s14   ;;  %s30_s16 = sadd.s32 1, %s626_s13  ;;  %s630_s14 = sphi %s660_s14, %s18_s14   ;;  %s626_s13 = sphi %s658_s13, %s840_s13   ;;  %s622_s12 = sphi %s656_s12, %s839_s12   ;;  %s618_s11 = sphi %s654_s11, %s838_s11   ;;  %s614_s10 = sphi %s652_s10, %s837_s10   ;;  %s610_s9 = sphi %s650_s9, %s836_s9  }
   0x7   : > { %p32_p0 = scmp.ge.s32.totalorder %s30_s16, 2  ;;  %s39_s17 = sadd.s32 1, %s618_s11 }
   0x8   : > { %p46_p1 = scmp.ne.s32.totalorder %s618_s11, %s614_s10  ;;  %p47_p2 = scmp.eq.s32.totalorder %s630_s14, 0 }
   0x9   : > { %s842_s16 = smov (%p32_p0, %s30_s16), 0  ;;  %p52_p4 = scmp.ne.s32.totalorder %s614_s10, %s610_s9 }
   0xa   : > { %p686_p3 = por %p47_p2, %p46_p1  ;;  %s34_s19 = ssub.s32 %s626_s13, %s842_s16 }
   0xb   : > { %p53_p5 = scmp.eq.s32.totalorder %s429_s15, 0  ;;  %p37_p6 = scmp.eq.s32.totalorder %s34_s19, 0 }
   0xc   : > { %p459_p8 = scmp.lt.s32.totalorder %s630_s14, 2  ;;  %s702_s22 = sand.u32 1, %s618_s11  }
   0xd   : > { %p693_p7 = por %p53_p5, %p52_p4  ;;  %s444_s23 = sshll.u32 %s626_s13, 7 }
   0xe   : > { %s699_s21 = scalar_select %p37_p6, %s618_s11, %s39_s17  }
   0xf   : > { %s829_s20 = scalar_select %p693_p7, 1, 0 }
  0x10   : > { %s433_s24 = sshll.u32 %s702_s22, 3  ;;  %s709_s27 = scalar_lea.hbm %s824_s0, %s444_s23 }
  0x11   : > { %s134_s28 = scalar_lea.vmem [#allocation2], %s433_s24  ;;  %p713_p9 = pnand %p459_p8, %p686_p3 }
  0x12   : > { %s144_s29 = sshll.u32 %s134_s28, 4  ;;  %s131_s3 = scalar_lea.sflag [#allocation3], %s702_s22  ;;  %s717_s29 = int_to_ptr.vmem [resolvable:$true] %s144_s29 }
  0x13   : > { %s516_s4 = scalar_lea.hbm %s709_s27, 128  ;;  %p518_p13 = pneg %p713_p9 }
  0x14   : > { %p517_p12 = scmp.ne.s32.totalorder %s709_s27, %s516_s4  ;;  %s521_s7 = scalar_lea.hbm %s824_s0, 256 }
  0x15   : > { %p522_p2 = scmp.lt.u32.totalorder %s709_s27, %s824_s0  ;;  %p523_p3 = scmp.lt.u32.totalorder %s521_s7, %s516_s4 }
  0x16   : > { %p519_p0 = pnand %p518_p13, %p517_p12  ;;  %p525_p5 = scmp.lt.u32.totalorder %s516_s4, %s709_s27 }
  0x17   : > { %p524_p4 = por %p523_p3, %p522_p2 }
  0x18   : > { %p520_p1 = pneg %p519_p0 }
  0x19   : > { %p526_p6 = por %p525_p5, %p524_p4 }
  0x1b   : > { %p527_p8 = pnand %p526_p6, %p520_p1 }
  0x1d   : > { %530 = shalt.err (!%p527_p8)
}
  0x1e   : > { %s531_s15 = scalar_lea.vmem %s717_s29, 128  ;;  %s632_s17 = smov [#allocation2]  }
  0x1f   : > { %p532_p12 = scmp.ne.s32.totalorder %s717_s29, %s531_s15  ;;  %s536_s18 = sshll.u32 %s632_s17, 4  ;;  %s537_s18 = int_to_ptr.vmem [resolvable:$false] %s536_s18 }
  0x20   : > { %s538_s19 = scalar_lea.vmem %s537_s18, 256  ;;  %p539_p11 = scmp.lt.s32.totalorder %s717_s29, %s537_s18 }
  0x21   : > { %p534_p0 = pnand %p532_p12, %p518_p13  ;;  %p540_p2 = scmp.lt.s32.totalorder %s538_s19, %s531_s15 }
  0x23   : > { %p535_p10 = pneg %p534_p0  ;;  %p541_p3 = por %p540_p2, %p539_p11 }
  0x25   : > { %p542_p4 = pnand %p541_p3, %p535_p10 }
  0x27   : > { %545 = shalt.err (!%p542_p4)
}
  0x28   : > { %455 = dma.hbm_to_vmem [thread:$0]  (!%p713_p9), %s709_s27, 128, %s717_s29, %s131_s3  }
  0x29   : > { %p831_p1 = scmp.lt.s32.totalorder %s630_s14, 3  ;;  %p832_p5 = scmp.ge.s32.totalorder %s630_s14, 1 }
  0x2a   : > { %s436_s24 = sshll.u32 %s702_s22, 1  ;;  %s445_s25 = sshll.u32 %s626_s13, 5 }
  0x2b   : > { %p751_p6 = pnand %p832_p5, %p831_p1  ;;  %s760_s4 = scalar_lea.hbm %s825_s1, %s445_s25 }
  0x2c   : > { %s155_s5 = scalar_lea.vmem [#allocation4], %s436_s24  ;;  %s152_s27 = scalar_lea.sflag [#allocation5], %s702_s22 }
  0x2d   : > { %s833_s23 = scalar_select %p751_p6, 1, 0 }
  0x2e   : > { %s165_s6 = sshll.u32 %s155_s5, 4  ;;  %s546_s29 = scalar_lea.hbm %s760_s4, 32  ;;  %s166_s6 = int_to_ptr.vmem [resolvable:$true] %s165_s6 }
  0x2f   : > { %p547_p10 = scmp.ne.s32.totalorder %s760_s4, %s546_s29  ;;  %s551_s8 = scalar_lea.hbm %s825_s1, 64 }
  0x30   : > { %p552_p12 = scmp.lt.u32.totalorder %s760_s4, %s825_s1  ;;  %p553_p0 = scmp.lt.u32.totalorder %s551_s8, %s546_s29 }
  0x31   : > { %p549_p11 = pnand %p547_p10, %p518_p13  ;;  %p555_p3 = scmp.lt.u32.totalorder %s546_s29, %s760_s4 }
  0x32   : > { %p554_p2 = por %p553_p0, %p552_p12 }
  0x33   : > { %p550_p8 = pneg %p549_p11 }
  0x34   : > { %p556_p4 = por %p555_p3, %p554_p2 }
  0x36   : > { %p557_p1 = pnand %p556_p4, %p550_p8 }
  0x38   : > { %560 = shalt.err (!%p557_p1)
}
  0x39   : > { %s561_s22 = scalar_lea.vmem %s166_s6, 32  ;;  %s633_s17 = smov [#allocation4]  }
  0x3a   : > { %p562_p5 = scmp.ne.s32.totalorder %s166_s6, %s561_s22  ;;  %s566_s18 = sshll.u32 %s633_s17, 4  ;;  %s567_s18 = int_to_ptr.vmem [resolvable:$false] %s566_s18 }
  0x3b   : > { %s568_s19 = scalar_lea.vmem %s567_s18, 64  ;;  %p569_p7 = scmp.lt.s32.totalorder %s166_s6, %s567_s18 }
  0x3c   : > { %p564_p10 = pnand %p562_p5, %p518_p13  ;;  %p570_p6 = scmp.lt.s32.totalorder %s568_s19, %s561_s22 }
  0x3e   : > { %p565_p11 = pneg %p564_p10  ;;  %p571_p0 = por %p570_p6, %p569_p7 }
  0x40   : > { %p572_p12 = pnand %p571_p0, %p565_p11 }
  0x42   : > { %575 = shalt.err (!%p572_p12)
}
  0x43   : > { %458 = dma.hbm_to_vmem [thread:$0]  (!%p713_p9), %s760_s4, 32, %s166_s6, %s152_s27  }
  0x44   : > { %p834_p8 = scmp.ne.s32.totalorder %s833_s23, 0 }
  0x45   : > { %s176_s24 = sand.u32 (!%p834_p8), 1, %s614_s10   ;;  %p835_p13 = scmp.ne.s32.totalorder (!%p834_p8), %s829_s20, 0 }
  0x46   : > { %174 = sbr.rel (%p834_p8) target bundleno = 357 (0x165), region = 28  ;;  %s440_s25 = sshll.u32 (!%p834_p8), %s176_s24, 3 }
  0x47   : > { %s177_s26 = scalar_lea.sflag (!%p834_p8), [#allocation3], %s176_s24  ;;  %s180_s28 = scalar_lea.vmem (!%p834_p8), [#allocation2], %s440_s25 }
  0x4d   : > { %601 = dma.done.wait (%p835_p13), %s177_s26, 128  }
  0x4e   : > { %603 = vsyncadd (%p835_p13), %s177_s26, 4294967168  ;;  %s441_s5 = sshll.u32 %s176_s24, 1  ;;  %s186_s29 = scalar_lea.sflag [#allocation5], %s176_s24 }
  0x4f   : > { %s189_s30 = scalar_lea.vmem [#allocation4], %s441_s5 }
  0x50   : > { %605 = dma.done.wait (%p835_p13), %s186_s29, 32  }
  0x51   : > { %607 = vsyncadd (%p835_p13), %s186_s29, 4294967264  ;;  %vm229_vm0 = vcmask 1043456   ;;  %v224_v0 = vld [vmem:[%s180_s28] sm:$0xff]  ;;  %v274_v15 = vlaneseq  ;;  %v225_v22 = vld [vmem:[%s189_s30] sm:$0x3]  ;;  %vm316_vm3 = vcmask 1040384  }
  0x52   : > { %v227_v1 = vcombine.high %v224_v0, %v224_v0  ;;  %v230_v2 = vsel %vm229_vm0, %v224_v0, -inf  ;;  %p215_p7 = scmp.lt.s32.totalorder %s622_s12, 1  ;;  %vm222_vm4 = vcmask 0  }
  0x53   : > { %v231_v3 = vrot.slane %v230_v2, 4  ;;  %v275_v18 = vshrl.u32 %v274_v15, 7 }
  0x54   : > { %v237_v4 = vsel %vm229_vm0, %v227_v1, -inf  ;;  %s844_s12 = smov (!%p215_p7, %s622_s12), 1 }
  0x55   : > { %v232_v5 = vmax.f32 %v230_v2, %v231_v3  ;;  %v238_v6 = vrot.slane %v237_v4, 4  ;;  %v278_v21 = vsub.s32 0, %v275_v18  ;;  %v282_v23 = vsub.s32 1, %v275_v18  ;;  %s217_s4 = scalar_lea.vmem %s826_s2, %s844_s12 }
  0x57   : > { %v233_v7 = vrot.slane %v232_v5, 2  ;;  %v239_v8 = vmax.f32 %v237_v4, %v238_v6  ;;  %v279_v24 = vrot.slane %v225_v22, %v278_v21  ;;  %v283_v25 = vrot.slane %v225_v22, %v282_v23 }
  0x59   : > { %v234_v9 = vmax.f32 %v232_v5, %v233_v7  ;;  %v240_v10 = vrot.slane %v239_v8, 2  ;;  %vm284_vm1 = vcmp.eq.s32.totalorder %v275_v18, %v279_v24  ;;  %vm285_vm2 = vcmp.eq.s32.totalorder %v275_v18, %v283_v25 }
  0x5a   : > { %v286_v26 = vsel %vm284_vm1, %v224_v0, 0.0  ;;  %v287_v30 = vsel %vm285_vm2, %v227_v1, 0.0  ;;  %v634_v5 = vmov 0.0  }
  0x5b   : > { %v235_v11 = vrot.slane %v234_v9, 1  ;;  %v241_v12 = vmax.f32 %v239_v8, %v240_v10  ;;  %v288_v32 = vsel %vm229_vm0, %v286_v26, 0.0  ;;  %v295_v36 = vsel %vm229_vm0, %v287_v30, 0.0  ;;  %223 = vst.msk [vmem:[%s217_s4] sm:$0x1] %vm222_vm4, %v634_v5 }
  0x5c   : > { %v289_v37 = vrot.slane %v288_v32, 4  ;;  %v296_v40 = vrot.slane %v295_v36, 4 }
  0x5d   : > { %v236_v13 = vmax.f32 %v234_v9, %v235_v11  ;;  %v242_v14 = vrot.slane %v241_v12, 1 }
  0x5e   : > { %v290_v43 = vadd.f32 %v289_v37, %v288_v32  ;;  %v297_v46 = vadd.f32 %v296_v40, %v295_v36 }
  0x5f   : > { %v243_v16 = vmax.f32 %v241_v12, %v242_v14 }
  0x60   : > { %v291_v49 = vrot.slane %v290_v43, 2  ;;  %v298_v51 = vrot.slane %v297_v46, 2 }
  0x61   : > { %v246_v17 = vcombine.low %v236_v13, %v243_v16 }
  0x62   : > { %v292_v52 = vadd.f32 %v291_v49, %v290_v43  ;;  %v299_v53 = vadd.f32 %v298_v51, %v297_v46 }
  0x63   : > { %v248_v19 = vsub.f32 %v224_v0, %v246_v17 }
  0x64   : > { %v293_v54 = vrot.slane %v292_v52, 1  ;;  %v300_v55 = vrot.slane %v299_v53, 1 }
  0x65   : > { %v249_v20 = vmul.f32 1.442695, %v248_v19 }
  0x66   : > { %v294_v58 = vadd.f32 %v293_v54, %v292_v52  ;;  %v301_v62 = vadd.f32 %v300_v55, %v299_v53 }
  0x67   : > { %510 = vpow2.f32 %v249_v20 }
  0x71   : > { %v511_v27 = vpop.eup %510 }
  0x72   : > { %v252_v28 = vcombine.high %v511_v27, %v511_v27  ;;  %v254_v29 = vsel %vm229_vm0, %v511_v27, 0.0 }
  0x73   : > { %v255_v31 = vrot.slane %v254_v29, 4 }
  0x74   : > { %v261_v33 = vsel %vm229_vm0, %v252_v28, 0.0 }
  0x75   : > { %v256_v34 = vadd.f32 %v255_v31, %v254_v29  ;;  %v262_v35 = vrot.slane %v261_v33, 4 }
  0x77   : > { %v257_v38 = vrot.slane %v256_v34, 2  ;;  %v263_v39 = vadd.f32 %v262_v35, %v261_v33 }
  0x79   : > { %v258_v41 = vadd.f32 %v257_v38, %v256_v34  ;;  %v264_v42 = vrot.slane %v263_v39, 2 }
  0x7b   : > { %v259_v44 = vrot.slane %v258_v41, 1  ;;  %v265_v45 = vadd.f32 %v264_v42, %v263_v39 }
  0x7d   : > { %v260_v47 = vadd.f32 %v259_v44, %v258_v41  ;;  %v266_v48 = vrot.slane %v265_v45, 1 }
  0x7f   : > { %v267_v50 = vadd.f32 %v266_v48, %v265_v45  ;;  %512 = vlog2.f32 %v260_v47 }
  0x81   : > { %514 = vlog2.f32 %v267_v50 }
  0x89   : > { %v513_v56 = vpop.eup %512 }
  0x8a   : > { %v269_v57 = vmul.f32 0.6931472, %v513_v56 }
  0x8b   : > { %v515_v59 = vpop.eup %514 }
  0x8c   : > { %v271_v60 = vmul.f32 0.6931472, %v515_v59  ;;  %v272_v61 = vadd.f32 %v269_v57, %v236_v13  ;;  %v315_v13 = vld [vmem:[%s217_s4] sm:$0x1] }
  0x8e   : > { %v273_v63 = vadd.f32 %v271_v60, %v243_v16  ;;  %v302_v0 = vsub.f32 %v272_v61, %v294_v58 }
  0x90   : > { %v303_v1 = vsub.f32 %v273_v63, %v301_v62  ;;  %v317_v2 = vsel %vm316_vm3, %v302_v0, 0.0 }
  0x92   : > { %v318_v3 = vsel %vm316_vm3, %v303_v1, 0.0 }
  0x93   : > { %v319_v4 = vadd.f32 %v318_v3, %v317_v2 }
  0x95   : > { %320 = vadd.xlane.f32.xlu0 %v319_v4 }
 0x122   : > { %v321_v6 = vpop.xlane.xlu0 %320 }
 0x123   : > { %v322_v7 = vrot.slane %v321_v6, 4 }
 0x125   : > { %v323_v8 = vadd.f32 %v322_v7, %v321_v6 }
 0x127   : > { %v324_v9 = vrot.slane %v323_v8, 2 }
 0x129   : > { %v325_v10 = vadd.f32 %v324_v9, %v323_v8 }
 0x12b   : > { %v326_v11 = vrot.slane %v325_v10, 1 }
 0x12d   : > { %v327_v12 = vadd.f32 %v326_v11, %v325_v10 }
 0x12f   : > { %446 = vpush %v327_v12 }
 0x160   : > { %s447_s6 = spop %446 }
 0x161   : > { %v329_v14 = vstv %s447_s6 }
 0x162   : > { %v330_v15 = vadd.f32 %v329_v14, %v315_v13 }
 0x164   : > { %332 = vst.msk [vmem:[%s217_s4] sm:$0x1] %vm222_vm4, %v330_v15 }
 0x165 PF: > { %s18_s14 = sadd.s32 1, %s630_s14   ;;  %s836_s9 = smov %s614_s10 }
 0x166   : > { %p15_p9 = scmp.ge.s32.totalorder %s18_s14, 4   ;;  %s837_s10 = smov %s618_s11 }
 0x167   : > { %s838_s11 = smov %s699_s21  ;;  %s839_s12 = smov %s626_s13 }
 0x168   : > { %s840_s13 = smov %s842_s16  ;;  %17 = sbr.rel (!%p15_p9) target bundleno = 6 (0x6), region = 85 }
 0x16f   :  { %350 = vsyncpa [#allocation3], 1 }
 0x170   :  { %352 = vsyncpa [#allocation3 + $0x1], 1 }
 0x171   :  { %353 = vsyncpa [#allocation5], 1 }
 0x172   :  { %355 = vsyncpa [#allocation5 + $0x1], 1 }

</bundles_post_ra>
